<compile_context>
chip_gen: v6e
topology: v6e:2x2x1
jax: 0.10.0
libtpu: 0.0.40
codegen_flags: <defaults>
</compile_context>

<pallas_src>
import functools
import math

import jax
import jax.numpy as jnp
from jax.experimental import pallas as pl
from jax.experimental.pallas import tpu as pltpu


def encoder_stack_kernel(
    x0_ref,                                   # (N, D)   f32  embedded input (tok+pos)
    wqkv_ref, bqkv_ref,                       # (1, D, 3D) bf16, (1, 1, 3D) f32
    wo_ref, bo_ref,                           # (1, D, D)  bf16, (1, 1, D)  f32
    g1_ref, be1_ref,                          # (1, 1, D)  f32   layernorm1
    w1_ref, bf1_ref,                          # (1, D, FF) bf16, (1, 1, FF) f32
    w2_ref, bf2_ref,                          # (1, FF, D) bf16, (1, 1, D)  f32
    g2_ref, be2_ref,                          # (1, 1, D)  f32   layernorm2
    o_ref,                                    # (N, D)   f32  resident activations / output
    *, num_heads, batch, seq, eps=1e-6):
  B, S, H = batch, seq, num_heads
  N, D = o_ref.shape
  hd = D // H
  f32 = jnp.float32
  bf16 = jnp.bfloat16

  # Layer 0: seed the resident activation slab.  The output block has a
  # constant index map, so it stays in VMEM across the whole layer grid and is
  # written back to HBM only once at the end.
  @pl.when(pl.program_id(0) == 0)
  def _():
    o_ref[...] = x0_ref[...]

  x = o_ref[...]                              # (N, D) f32

  def mm(a, w_ref):
    # Weights are already bf16; cast activations at the MXU, accumulate f32.
    return jnp.dot(a.astype(bf16), w_ref[0], preferred_element_type=f32)

  # ---- fused QKV projection: one (N, D) x (D, 3D) MXU push -------------------
  # (softmax scale is pre-folded into the Q columns of wqkv/bqkv)
  qkv = mm(x, wqkv_ref) + bqkv_ref[0]         # (N, 3D) f32

  # ---- (batch*head)-batched scaled dot-product attention ---------------------
  # One batched transpose of the whole slab puts features on sublanes; q/k/v
  # and heads are then split with layout-preserving leading-dim reshapes
  # (hd stays a whole sublane-tile multiple).  No per-head / per-batch loops.
  qkvT = jnp.swapaxes(qkv.reshape(B, S, 3 * D), 1, 2)     # (B, 3D, S)
  qkvT = qkvT.reshape(B, 3, H, hd, S)
  qT = qkvT[:, 0].reshape(B * H, hd, S)       # (BH, hd, S)
  kT = qkvT[:, 1].reshape(B * H, hd, S)
  vT = qkvT[:, 2].reshape(B * H, hd, S)

  # Scores contract over the head-dim of both transposed operands.
  s = jnp.einsum('ndq,ndk->nqk', qT.astype(bf16), kT.astype(bf16),
                 preferred_element_type=f32)              # (BH, S, S) f32
  s = s - jnp.max(s, axis=-1, keepdims=True)
  p = jnp.exp(s)
  p = p * pl.reciprocal(jnp.sum(p, axis=-1, keepdims=True), approx=True)

  ctxT = jnp.einsum('ndk,nqk->ndq', vT.astype(bf16), p.astype(bf16),
                    preferred_element_type=f32)           # (BH, hd, S) f32
  ctx = jnp.swapaxes(ctxT.reshape(B, D, S), 1, 2).reshape(N, D)

  attn = mm(ctx, wo_ref) + bo_ref[0]          # (N, D) f32

  # ---- residual + LayerNorm1 (eval: dropout == identity) ---------------------
  y = x + attn
  mu = jnp.mean(y, axis=-1, keepdims=True)
  var = jnp.mean(jnp.square(y - mu), axis=-1, keepdims=True)
  y = (y - mu) * jax.lax.rsqrt(var + eps) * g1_ref[0] + be1_ref[0]

  # ---- FFN: Linear -> ReLU -> Linear ------------------------------------------
  h1 = jnp.maximum(mm(y, w1_ref) + bf1_ref[0], 0.0)
  z = mm(h1, w2_ref) + bf2_ref[0]

  # ---- residual + LayerNorm2 ---------------------------------------------------
  t = y + z
  mu2 = jnp.mean(t, axis=-1, keepdims=True)
  var2 = jnp.mean(jnp.square(t - mu2), axis=-1, keepdims=True)
  o_ref[...] = (t - mu2) * jax.lax.rsqrt(var2 + eps) * g2_ref[0] + be2_ref[0]


PARAM_ORDER = ("wqkv", "bqkv", "wo", "bo", "g1", "be1",
               "w1", "bf1", "w2", "bf2", "g2", "be2")


def prepare_params(params, num_heads):
  """Offline prep: fold 1/sqrt(head_dim) into the Q columns of wqkv/bqkv and
  store the four big matmul weights as bf16 (halves weight DMA + VMEM).
  Biases and LayerNorm params stay f32."""
  D = params["wo"].shape[1]
  scale = 1.0 / math.sqrt(D // num_heads)
  qcols = jnp.concatenate([jnp.full((D,), scale, jnp.float32),
                           jnp.ones((2 * D,), jnp.float32)])
  p = dict(params)
  p["wqkv"] = (params["wqkv"] * qcols).astype(jnp.bfloat16)
  p["bqkv"] = (params["bqkv"] * qcols).astype(jnp.float32)
  for k in ("wo", "w1", "w2"):
    p[k] = params[k].astype(jnp.bfloat16)
  for k in ("bo", "g1", "be1", "bf1", "bf2", "g2", "be2"):
    p[k] = params[k].astype(jnp.float32)
  return p


@functools.partial(jax.jit, static_argnames=("num_heads",))
def transformer_encoder(token_ids, tok_emb, pos_emb, params, num_heads):
  """token_ids: (B, S) int32 -> (B, S, D) f32.  `params` comes from prepare_params."""
  B, S = token_ids.shape
  D = tok_emb.shape[1]
  L = params["wqkv"].shape[0]
  assert D % num_heads == 0 and S <= pos_emb.shape[0]

  # Embedding gather + positional add are glue (plain XLA); the kernel gets a
  # single lane-dense (B*S, D) slab.
  x0 = (jnp.take(tok_emb, token_ids, axis=0) + pos_emb[None, :S, :]
        ).astype(jnp.float32).reshape(B * S, D)

  plist = [params[k] for k in PARAM_ORDER]

  def layer_spec(p):
    # One per-layer slice per grid step; trailing block dims == full array dims.
    return pl.BlockSpec((1,) + p.shape[1:],
                        lambda l, _nd=p.ndim: (l,) + (0,) * (_nd - 1))

  in_specs = [pl.BlockSpec((B * S, D), lambda l: (0, 0))]
  in_specs += [layer_spec(p) for p in plist]
  # Single 2-D output slab, revisited (VMEM-resident) across all layers.
  out_specs = pl.BlockSpec((B * S, D), lambda l: (0, 0))

  kernel = functools.partial(encoder_stack_kernel,
                             num_heads=num_heads, batch=B, seq=S)

  out = pl.pallas_call(
      kernel,
      out_shape=jax.ShapeDtypeStruct((B * S, D), jnp.float32),
      grid=(L,),
      in_specs=in_specs,
      out_specs=out_specs,
      compiler_params=pltpu.CompilerParams(
          # Layers are strictly sequential (output carried across this axis);
          # do not megacore-split this serial axis.
          dimension_semantics=("arbitrary",),
          vmem_limit_bytes=64 * 1024 * 1024),
  )(x0, *plist)
  return out.reshape(B, S, D)


def init_stacked_params(key, num_layers, embed_dim, ff_dim):
  """Per-layer parameters stacked along a leading 'layer' axis (f32 masters)."""
  D, FF, L = embed_dim, ff_dim, num_layers
  ks = jax.random.split(key, 4)
  s = 0.02
  return {
      "wqkv": s * jax.random.normal(ks[0], (L, D, 3 * D), jnp.float32),
      "bqkv": jnp.zeros((L, 1, 3 * D), jnp.float32),
      "wo":   s * jax.random.normal(ks[1], (L, D, D), jnp.float32),
      "bo":   jnp.zeros((L, 1, D), jnp.float32),
      "g1":   jnp.ones((L, 1, D), jnp.float32),
      "be1":  jnp.zeros((L, 1, D), jnp.float32),
      "w1":   s * jax.random.normal(ks[2], (L, D, FF), jnp.float32),
      "bf1":  jnp.zeros((L, 1, FF), jnp.float32),
      "w2":   s * jax.random.normal(ks[3], (L, FF, D), jnp.float32),
      "bf2":  jnp.zeros((L, 1, D), jnp.float32),
      "g2":   jnp.ones((L, 1, D), jnp.float32),
      "be2":  jnp.zeros((L, 1, D), jnp.float32),
  }


if __name__ == "__main__":
  # Small config consistent with the module's __init__.
  src_vocab_size = 50
  embed_dim = 32
  max_len = 16
  num_layers = 2
  num_heads = 4
  ff_dim = 64
  B, S = 2, 8

  root = jax.random.PRNGKey(0)
  k_tok, k_pos, k_ids, k_layers = jax.random.split(root, 4)

  tok_emb = 0.02 * jax.random.normal(k_tok, (src_vocab_size, embed_dim), jnp.float32)
  pos_emb = 0.02 * jax.random.normal(k_pos, (max_len, embed_dim), jnp.float32)
  params = init_stacked_params(k_layers, num_layers, embed_dim, ff_dim)
  token_ids = jax.random.randint(k_ids, (B, S), 0, src_vocab_size, jnp.int32)

  kparams = prepare_params(params, num_heads)
  out = transformer_encoder(token_ids, tok_emb, pos_emb, kparams, num_heads)
  out = jax.block_until_ready(out)
  assert out.shape == (B, S, embed_dim) and out.dtype == jnp.float32
  assert bool(jnp.all(jnp.isfinite(out)))
  print("KERNEL_OK")
</pallas_src>

<mosaic_0001>
module attributes {stable_mosaic.version = 11 : i64} {
  func.func @encoder_stack_kernel(%arg0: i32, %arg1: memref<16x32xf32, #tpu.memory_space<vmem>>, %arg2: memref<1x32x96xbf16, #tpu.memory_space<vmem>>, %arg3: memref<1x1x96xf32, #tpu.memory_space<vmem>>, %arg4: memref<1x32x32xbf16, #tpu.memory_space<vmem>>, %arg5: memref<1x1x32xf32, #tpu.memory_space<vmem>>, %arg6: memref<1x1x32xf32, #tpu.memory_space<vmem>>, %arg7: memref<1x1x32xf32, #tpu.memory_space<vmem>>, %arg8: memref<1x32x64xbf16, #tpu.memory_space<vmem>>, %arg9: memref<1x1x64xf32, #tpu.memory_space<vmem>>, %arg10: memref<1x64x32xbf16, #tpu.memory_space<vmem>>, %arg11: memref<1x1x32xf32, #tpu.memory_space<vmem>>, %arg12: memref<1x1x32xf32, #tpu.memory_space<vmem>>, %arg13: memref<1x1x32xf32, #tpu.memory_space<vmem>>, %arg14: memref<16x32xf32, #tpu.memory_space<vmem>>) attributes {dimension_semantics = [#tpu.dimension_semantics<arbitrary>], iteration_bounds = array<i64: 2>, scalar_prefetch = 0 : i64, scratch_operands = 0 : i64, tpu.core_type = #tpu.core_type<tc>, window_params = [{pipeline_mode = #tpu.pipeline_mode<synchronous>, transform_indices = @transform_0, window_bounds = array<i64: 16, 32>}, {transform_indices = @transform_1, window_bounds = array<i64: 1, 32, 96>}, {transform_indices = @transform_2, window_bounds = array<i64: 1, 1, 96>}, {transform_indices = @transform_3, window_bounds = array<i64: 1, 32, 32>}, {transform_indices = @transform_4, window_bounds = array<i64: 1, 1, 32>}, {transform_indices = @transform_5, window_bounds = array<i64: 1, 1, 32>}, {transform_indices = @transform_6, window_bounds = array<i64: 1, 1, 32>}, {transform_indices = @transform_7, window_bounds = array<i64: 1, 32, 64>}, {transform_indices = @transform_8, window_bounds = array<i64: 1, 1, 64>}, {transform_indices = @transform_9, window_bounds = array<i64: 1, 64, 32>}, {transform_indices = @transform_10, window_bounds = array<i64: 1, 1, 32>}, {transform_indices = @transform_11, window_bounds = array<i64: 1, 1, 32>}, {transform_indices = @transform_12, window_bounds = array<i64: 1, 1, 32>}, {pipeline_mode = #tpu.pipeline_mode<synchronous>, transform_indices = @transform_13, window_bounds = array<i64: 16, 32>}]} {
    %c0_i32 = arith.constant 0 : i32
    %0 = arith.cmpi eq, %arg0, %c0_i32 : i32
    %1 = arith.extui %0 : i1 to i32
    %c0_i32_0 = arith.constant 0 : i32
    %2 = arith.cmpi ne, %1, %c0_i32_0 : i32
    scf.if %2 {
      %c0_58 = arith.constant 0 : index
      %c0_59 = arith.constant 0 : index
      %124 = vector.load %arg1[%c0_58, %c0_59] : memref<16x32xf32, #tpu.memory_space<vmem>>, vector<16x32xf32>
      %c0_60 = arith.constant 0 : index
      %c0_61 = arith.constant 0 : index
      %125 = vector.load %arg14[%c0_60, %c0_61] : memref<16x32xf32, #tpu.memory_space<vmem>>, vector<16x32xf32>
      tpu.vector_store %arg14[%c0_60, %c0_61], %124 {strides = array<i32>} : memref<16x32xf32, #tpu.memory_space<vmem>>, vector<16x32xf32>,
    } else {
    }
    %c0 = arith.constant 0 : index
    %c0_1 = arith.constant 0 : index
    %3 = vector.load %arg14[%c0, %c0_1] : memref<16x32xf32, #tpu.memory_space<vmem>>, vector<16x32xf32>
    %4 = arith.truncf %3 : vector<16x32xf32> to vector<16x32xbf16>
    %c0_2 = arith.constant 0 : index
    %c0_3 = arith.constant 0 : index
    %c0_4 = arith.constant 0 : index
    %5 = vector.load %arg2[%c0_2, %c0_3, %c0_4] : memref<1x32x96xbf16, #tpu.memory_space<vmem>>, vector<1x32x96xbf16>
    %6 = vector.shape_cast %5 : vector<1x32x96xbf16> to vector<32x96xbf16>
    %cst = arith.constant dense<0.000000e+00> : vector<16x96xf32>
    %7 = tpu.matmul %4, %6, %cst {dimension_numbers = #tpu.dot_dimension_numbers<[1], [0], [0], [1], [0, 0, 1, 1], [], []>} : vector<16x32xbf16>, vector<32x96xbf16>, vector<16x96xf32> -> vector<16x96xf32>
    %c0_5 = arith.constant 0 : index
    %c0_6 = arith.constant 0 : index
    %c0_7 = arith.constant 0 : index
    %8 = vector.load %arg3[%c0_5, %c0_6, %c0_7] : memref<1x1x96xf32, #tpu.memory_space<vmem>>, vector<1x1x96xf32>
    %9 = vector.shape_cast %8 : vector<1x1x96xf32> to vector<1x96xf32>
    %10 = vector.broadcast %9 : vector<1x96xf32> to vector<16x96xf32>
    %11 = arith.addf %7, %10 : vector<16x96xf32>
    %12 = vector.shape_cast %11 : vector<16x96xf32> to vector<2x8x96xf32>
    %13 = tpu.transpose %12, [0, 2, 1] : vector<2x8x96xf32> -> vector<2x96x8xf32>
    %14 = vector.shape_cast %13 : vector<2x96x8xf32> to vector<2x3x4x8x8xf32>
    %15 = vector.extract_strided_slice %14 {offsets = [0, 0, 0, 0, 0], sizes = [2, 1, 4, 8, 8], strides = [1, 1, 1, 1, 1]} : vector<2x3x4x8x8xf32> to vector<2x1x4x8x8xf32>
    %16 = vector.shape_cast %15 : vector<2x1x4x8x8xf32> to vector<2x4x8x8xf32>
    %17 = vector.shape_cast %16 : vector<2x4x8x8xf32> to vector<8x8x8xf32>
    %18 = vector.extract_strided_slice %14 {offsets = [0, 1, 0, 0, 0], sizes = [2, 1, 4, 8, 8], strides = [1, 1, 1, 1, 1]} : vector<2x3x4x8x8xf32> to vector<2x1x4x8x8xf32>
    %19 = vector.shape_cast %18 : vector<2x1x4x8x8xf32> to vector<2x4x8x8xf32>
    %20 = vector.shape_cast %19 : vector<2x4x8x8xf32> to vector<8x8x8xf32>
    %21 = vector.extract_strided_slice %14 {offsets = [0, 2, 0, 0, 0], sizes = [2, 1, 4, 8, 8], strides = [1, 1, 1, 1, 1]} : vector<2x3x4x8x8xf32> to vector<2x1x4x8x8xf32>
    %22 = vector.shape_cast %21 : vector<2x1x4x8x8xf32> to vector<2x4x8x8xf32>
    %23 = vector.shape_cast %22 : vector<2x4x8x8xf32> to vector<8x8x8xf32>
    %24 = arith.truncf %17 : vector<8x8x8xf32> to vector<8x8x8xbf16>
    %25 = arith.truncf %20 : vector<8x8x8xf32> to vector<8x8x8xbf16>
    "tpu.trace_start"() <{level = 10 : i32, message = "ndq,ndk->nqk"}> : () -> ()
    %cst_8 = arith.constant dense<0.000000e+00> : vector<8x8x8xf32>
    %26 = tpu.matmul %24, %25, %cst_8 {dimension_numbers = #tpu.dot_dimension_numbers<[1], [1], [2], [2], [0, 0, 0, 2, 1, 2], [0], [0]>} : vector<8x8x8xbf16>, vector<8x8x8xbf16>, vector<8x8x8xf32> -> vector<8x8x8xf32>
    "tpu.trace_stop"() : () -> ()
    %cst_9 = arith.constant dense<0xFF800000> : vector<8x8xf32>
    %27 = vector.multi_reduction <maximumf>, %26, %cst_9 [2] : vector<8x8x8xf32> to vector<8x8xf32>
    %28 = vector.shape_cast %27 : vector<8x8xf32> to vector<8x8x1xf32>
    %29 = vector.broadcast %28 : vector<8x8x1xf32> to vector<8x8x8xf32>
    %30 = arith.subf %26, %29 : vector<8x8x8xf32>
    %31 = math.exp %30 : vector<8x8x8xf32>
    %cst_10 = arith.constant dense<0.000000e+00> : vector<8x8xf32>
    %32 = vector.multi_reduction <add>, %31, %cst_10 [2] : vector<8x8x8xf32> to vector<8x8xf32>
    %33 = vector.shape_cast %32 : vector<8x8xf32> to vector<8x8x1xf32>
    %34 = tpu.reciprocal %33 {approx = true} : vector<8x8x1xf32> -> vector<8x8x1xf32>
    %35 = vector.broadcast %34 : vector<8x8x1xf32> to vector<8x8x8xf32>
    %36 = arith.mulf %31, %35 : vector<8x8x8xf32>
    %37 = arith.truncf %23 : vector<8x8x8xf32> to vector<8x8x8xbf16>
    %38 = arith.truncf %36 : vector<8x8x8xf32> to vector<8x8x8xbf16>
    "tpu.trace_start"() <{level = 10 : i32, message = "ndk,nqk->ndq"}> : () -> ()
    %cst_11 = arith.constant dense<0.000000e+00> : vector<8x8x8xf32>
    %39 = tpu.matmul %37, %38, %cst_11 {dimension_numbers = #tpu.dot_dimension_numbers<[2], [2], [1], [1], [0, 0, 0, 1, 1, 1], [0], [0]>} : vector<8x8x8xbf16>, vector<8x8x8xbf16>, vector<8x8x8xf32> -> vector<8x8x8xf32>
    "tpu.trace_stop"() : () -> ()
    %40 = vector.shape_cast %39 : vector<8x8x8xf32> to vector<2x32x8xf32>
    %41 = tpu.transpose %40, [0, 2, 1] : vector<2x32x8xf32> -> vector<2x8x32xf32>
    %42 = vector.shape_cast %41 : vector<2x8x32xf32> to vector<16x32xf32>
    %43 = arith.truncf %42 : vector<16x32xf32> to vector<16x32xbf16>
    %c0_12 = arith.constant 0 : index
    %c0_13 = arith.constant 0 : index
    %c0_14 = arith.constant 0 : index
    %44 = vector.load %arg4[%c0_12, %c0_13, %c0_14] : memref<1x32x32xbf16, #tpu.memory_space<vmem>>, vector<1x32x32xbf16>
    %45 = vector.shape_cast %44 : vector<1x32x32xbf16> to vector<32x32xbf16>
    %cst_15 = arith.constant dense<0.000000e+00> : vector<16x32xf32>
    %46 = tpu.matmul %43, %45, %cst_15 {dimension_numbers = #tpu.dot_dimension_numbers<[1], [0], [0], [1], [0, 0, 1, 1], [], []>} : vector<16x32xbf16>, vector<32x32xbf16>, vector<16x32xf32> -> vector<16x32xf32>
    %c0_16 = arith.constant 0 : index
    %c0_17 = arith.constant 0 : index
    %c0_18 = arith.constant 0 : index
    %47 = vector.load %arg5[%c0_16, %c0_17, %c0_18] : memref<1x1x32xf32, #tpu.memory_space<vmem>>, vector<1x1x32xf32>
    %48 = vector.shape_cast %47 : vector<1x1x32xf32> to vector<1x32xf32>
    %49 = vector.broadcast %48 : vector<1x32xf32> to vector<16x32xf32>
    %50 = arith.addf %46, %49 : vector<16x32xf32>
    %51 = arith.addf %3, %50 : vector<16x32xf32>
    %cst_19 = arith.constant dense<0.000000e+00> : vector<16xf32>
    %52 = vector.multi_reduction <add>, %51, %cst_19 [1] : vector<16x32xf32> to vector<16xf32>
    %53 = vector.shape_cast %52 : vector<16xf32> to vector<16x1xf32>
    %cst_20 = arith.constant 3.200000e+01 : f32
    %54 = vector.broadcast %cst_20 : f32 to vector<16x1xf32>
    %55 = arith.divf %53, %54 : vector<16x1xf32>
    %56 = vector.broadcast %55 : vector<16x1xf32> to vector<16x32xf32>
    %57 = arith.subf %51, %56 : vector<16x32xf32>
    %58 = arith.mulf %57, %57 : vector<16x32xf32>
    %cst_21 = arith.constant dense<0.000000e+00> : vector<16xf32>
    %59 = vector.multi_reduction <add>, %58, %cst_21 [1] : vector<16x32xf32> to vector<16xf32>
    %60 = vector.shape_cast %59 : vector<16xf32> to vector<16x1xf32>
    %cst_22 = arith.constant 3.200000e+01 : f32
    %61 = vector.broadcast %cst_22 : f32 to vector<16x1xf32>
    %62 = arith.divf %60, %61 : vector<16x1xf32>
    %63 = vector.broadcast %55 : vector<16x1xf32> to vector<16x32xf32>
    %64 = arith.subf %51, %63 : vector<16x32xf32>
    %cst_23 = arith.constant 9.99999997E-7 : f32
    %65 = vector.broadcast %cst_23 : f32 to vector<16x1xf32>
    %66 = arith.addf %62, %65 : vector<16x1xf32>
    %67 = math.rsqrt %66 : vector<16x1xf32>
    %68 = vector.broadcast %67 : vector<16x1xf32> to vector<16x32xf32>
    %69 = arith.mulf %64, %68 : vector<16x32xf32>
    %c0_24 = arith.constant 0 : index
    %c0_25 = arith.constant 0 : index
    %c0_26 = arith.constant 0 : index
    %70 = vector.load %arg6[%c0_24, %c0_25, %c0_26] : memref<1x1x32xf32, #tpu.memory_space<vmem>>, vector<1x1x32xf32>
    %71 = vector.shape_cast %70 : vector<1x1x32xf32> to vector<1x32xf32>
    %72 = vector.broadcast %71 : vector<1x32xf32> to vector<16x32xf32>
    %73 = arith.mulf %69, %72 : vector<16x32xf32>
    %c0_27 = arith.constant 0 : index
    %c0_28 = arith.constant 0 : index
    %c0_29 = arith.constant 0 : index
    %74 = vector.load %arg7[%c0_27, %c0_28, %c0_29] : memref<1x1x32xf32, #tpu.memory_space<vmem>>, vector<1x1x32xf32>
    %75 = vector.shape_cast %74 : vector<1x1x32xf32> to vector<1x32xf32>
    %76 = vector.broadcast %75 : vector<1x32xf32> to vector<16x32xf32>
    %77 = arith.addf %73, %76 : vector<16x32xf32>
    %78 = arith.truncf %77 : vector<16x32xf32> to vector<16x32xbf16>
    %c0_30 = arith.constant 0 : index
    %c0_31 = arith.constant 0 : index
    %c0_32 = arith.constant 0 : index
    %79 = vector.load %arg8[%c0_30, %c0_31, %c0_32] : memref<1x32x64xbf16, #tpu.memory_space<vmem>>, vector<1x32x64xbf16>
    %80 = vector.shape_cast %79 : vector<1x32x64xbf16> to vector<32x64xbf16>
    %cst_33 = arith.constant dense<0.000000e+00> : vector<16x64xf32>
    %81 = tpu.matmul %78, %80, %cst_33 {dimension_numbers = #tpu.dot_dimension_numbers<[1], [0], [0], [1], [0, 0, 1, 1], [], []>} : vector<16x32xbf16>, vector<32x64xbf16>, vector<16x64xf32> -> vector<16x64xf32>
    %c0_34 = arith.constant 0 : index
    %c0_35 = arith.constant 0 : index
    %c0_36 = arith.constant 0 : index
    %82 = vector.load %arg9[%c0_34, %c0_35, %c0_36] : memref<1x1x64xf32, #tpu.memory_space<vmem>>, vector<1x1x64xf32>
    %83 = vector.shape_cast %82 : vector<1x1x64xf32> to vector<1x64xf32>
    %84 = vector.broadcast %83 : vector<1x64xf32> to vector<16x64xf32>
    %85 = arith.addf %81, %84 : vector<16x64xf32>
    %cst_37 = arith.constant 0.000000e+00 : f32
    %86 = vector.broadcast %cst_37 : f32 to vector<16x64xf32>
    %87 = arith.maximumf %85, %86 : vector<16x64xf32>
    %88 = arith.truncf %87 : vector<16x64xf32> to vector<16x64xbf16>
    %c0_38 = arith.constant 0 : index
    %c0_39 = arith.constant 0 : index
    %c0_40 = arith.constant 0 : index
    %89 = vector.load %arg10[%c0_38, %c0_39, %c0_40] : memref<1x64x32xbf16, #tpu.memory_space<vmem>>, vector<1x64x32xbf16>
    %90 = vector.shape_cast %89 : vector<1x64x32xbf16> to vector<64x32xbf16>
    %cst_41 = arith.constant dense<0.000000e+00> : vector<16x32xf32>
    %91 = tpu.matmul %88, %90, %cst_41 {dimension_numbers = #tpu.dot_dimension_numbers<[1], [0], [0], [1], [0, 0, 1, 1], [], []>} : vector<16x64xbf16>, vector<64x32xbf16>, vector<16x32xf32> -> vector<16x32xf32>
    %c0_42 = arith.constant 0 : index
    %c0_43 = arith.constant 0 : index
    %c0_44 = arith.constant 0 : index
    %92 = vector.load %arg11[%c0_42, %c0_43, %c0_44] : memref<1x1x32xf32, #tpu.memory_space<vmem>>, vector<1x1x32xf32>
    %93 = vector.shape_cast %92 : vector<1x1x32xf32> to vector<1x32xf32>
    %94 = vector.broadcast %93 : vector<1x32xf32> to vector<16x32xf32>
    %95 = arith.addf %91, %94 : vector<16x32xf32>
    %96 = arith.addf %77, %95 : vector<16x32xf32>
    %cst_45 = arith.constant dense<0.000000e+00> : vector<16xf32>
    %97 = vector.multi_reduction <add>, %96, %cst_45 [1] : vector<16x32xf32> to vector<16xf32>
    %98 = vector.shape_cast %97 : vector<16xf32> to vector<16x1xf32>
    %cst_46 = arith.constant 3.200000e+01 : f32
    %99 = vector.broadcast %cst_46 : f32 to vector<16x1xf32>
    %100 = arith.divf %98, %99 : vector<16x1xf32>
    %101 = vector.broadcast %100 : vector<16x1xf32> to vector<16x32xf32>
    %102 = arith.subf %96, %101 : vector<16x32xf32>
    %103 = arith.mulf %102, %102 : vector<16x32xf32>
    %cst_47 = arith.constant dense<0.000000e+00> : vector<16xf32>
    %104 = vector.multi_reduction <add>, %103, %cst_47 [1] : vector<16x32xf32> to vector<16xf32>
    %105 = vector.shape_cast %104 : vector<16xf32> to vector<16x1xf32>
    %cst_48 = arith.constant 3.200000e+01 : f32
    %106 = vector.broadcast %cst_48 : f32 to vector<16x1xf32>
    %107 = arith.divf %105, %106 : vector<16x1xf32>
    %108 = vector.broadcast %100 : vector<16x1xf32> to vector<16x32xf32>
    %109 = arith.subf %96, %108 : vector<16x32xf32>
    %cst_49 = arith.constant 9.99999997E-7 : f32
    %110 = vector.broadcast %cst_49 : f32 to vector<16x1xf32>
    %111 = arith.addf %107, %110 : vector<16x1xf32>
    %112 = math.rsqrt %111 : vector<16x1xf32>
    %113 = vector.broadcast %112 : vector<16x1xf32> to vector<16x32xf32>
    %114 = arith.mulf %109, %113 : vector<16x32xf32>
    %c0_50 = arith.constant 0 : index
    %c0_51 = arith.constant 0 : index
    %c0_52 = arith.constant 0 : index
    %115 = vector.load %arg12[%c0_50, %c0_51, %c0_52] : memref<1x1x32xf32, #tpu.memory_space<vmem>>, vector<1x1x32xf32>
    %116 = vector.shape_cast %115 : vector<1x1x32xf32> to vector<1x32xf32>
    %117 = vector.broadcast %116 : vector<1x32xf32> to vector<16x32xf32>
    %118 = arith.mulf %114, %117 : vector<16x32xf32>
    %c0_53 = arith.constant 0 : index
    %c0_54 = arith.constant 0 : index
    %c0_55 = arith.constant 0 : index
    %119 = vector.load %arg13[%c0_53, %c0_54, %c0_55] : memref<1x1x32xf32, #tpu.memory_space<vmem>>, vector<1x1x32xf32>
    %120 = vector.shape_cast %119 : vector<1x1x32xf32> to vector<1x32xf32>
    %121 = vector.broadcast %120 : vector<1x32xf32> to vector<16x32xf32>
    %122 = arith.addf %118, %121 : vector<16x32xf32>
    %c0_56 = arith.constant 0 : index
    %c0_57 = arith.constant 0 : index
    %123 = vector.load %arg14[%c0_56, %c0_57] : memref<16x32xf32, #tpu.memory_space<vmem>>, vector<16x32xf32>
    tpu.vector_store %arg14[%c0_56, %c0_57], %122 {strides = array<i32>} : memref<16x32xf32, #tpu.memory_space<vmem>>, vector<16x32xf32>,
    return
  }
  func.func @transform_0(%arg0: i32) -> (i32, i32) {
    %c0_i32 = arith.constant 0 : i32
    %c0_i32_0 = arith.constant 0 : i32
    %c0_i32_1 = arith.constant 0 : i32
    return %c0_i32, %c0_i32_0 : i32, i32
  }
  func.func @transform_1(%arg0: i32) -> (i32, i32, i32) {
    %c0_i32 = arith.constant 0 : i32
    %c0_i32_0 = arith.constant 0 : i32
    %c0_i32_1 = arith.constant 0 : i32
    return %arg0, %c0_i32, %c0_i32_0 : i32, i32, i32
  }
  func.func @transform_2(%arg0: i32) -> (i32, i32, i32) {
    %c0_i32 = arith.constant 0 : i32
    %c0_i32_0 = arith.constant 0 : i32
    %c0_i32_1 = arith.constant 0 : i32
    return %arg0, %c0_i32, %c0_i32_0 : i32, i32, i32
  }
  func.func @transform_3(%arg0: i32) -> (i32, i32, i32) {
    %c0_i32 = arith.constant 0 : i32
    %c0_i32_0 = arith.constant 0 : i32
    %c0_i32_1 = arith.constant 0 : i32
    return %arg0, %c0_i32, %c0_i32_0 : i32, i32, i32
  }
  func.func @transform_4(%arg0: i32) -> (i32, i32, i32) {
    %c0_i32 = arith.constant 0 : i32
    %c0_i32_0 = arith.constant 0 : i32
    %c0_i32_1 = arith.constant 0 : i32
    return %arg0, %c0_i32, %c0_i32_0 : i32, i32, i32
  }
  func.func @transform_5(%arg0: i32) -> (i32, i32, i32) {
    %c0_i32 = arith.constant 0 : i32
    %c0_i32_0 = arith.constant 0 : i32
    %c0_i32_1 = arith.constant 0 : i32
    return %arg0, %c0_i32, %c0_i32_0 : i32, i32, i32
  }
  func.func @transform_6(%arg0: i32) -> (i32, i32, i32) {
    %c0_i32 = arith.constant 0 : i32
    %c0_i32_0 = arith.constant 0 : i32
    %c0_i32_1 = arith.constant 0 : i32
    return %arg0, %c0_i32, %c0_i32_0 : i32, i32, i32
  }
  func.func @transform_7(%arg0: i32) -> (i32, i32, i32) {
    %c0_i32 = arith.constant 0 : i32
    %c0_i32_0 = arith.constant 0 : i32
    %c0_i32_1 = arith.constant 0 : i32
    return %arg0, %c0_i32, %c0_i32_0 : i32, i32, i32
  }
  func.func @transform_8(%arg0: i32) -> (i32, i32, i32) {
    %c0_i32 = arith.constant 0 : i32
    %c0_i32_0 = arith.constant 0 : i32
    %c0_i32_1 = arith.constant 0 : i32
    return %arg0, %c0_i32, %c0_i32_0 : i32, i32, i32
  }
  func.func @transform_9(%arg0: i32) -> (i32, i32, i32) {
    %c0_i32 = arith.constant 0 : i32
    %c0_i32_0 = arith.constant 0 : i32
    %c0_i32_1 = arith.constant 0 : i32
    return %arg0, %c0_i32, %c0_i32_0 : i32, i32, i32
  }
  func.func @transform_10(%arg0: i32) -> (i32, i32, i32) {
    %c0_i32 = arith.constant 0 : i32
    %c0_i32_0 = arith.constant 0 : i32
    %c0_i32_1 = arith.constant 0 : i32
    return %arg0, %c0_i32, %c0_i32_0 : i32, i32, i32
  }
  func.func @transform_11(%arg0: i32) -> (i32, i32, i32) {
    %c0_i32 = arith.constant 0 : i32
    %c0_i32_0 = arith.constant 0 : i32
    %c0_i32_1 = arith.constant 0 : i32
    return %arg0, %c0_i32, %c0_i32_0 : i32, i32, i32
  }
  func.func @transform_12(%arg0: i32) -> (i32, i32, i32) {
    %c0_i32 = arith.constant 0 : i32
    %c0_i32_0 = arith.constant 0 : i32
    %c0_i32_1 = arith.constant 0 : i32
    return %arg0, %c0_i32, %c0_i32_0 : i32, i32, i32
  }
  func.func @transform_13(%arg0: i32) -> (i32, i32) {
    %c0_i32 = arith.constant 0 : i32
    %c0_i32_0 = arith.constant 0 : i32
    %c0_i32_1 = arith.constant 0 : i32
    return %c0_i32, %c0_i32_0 : i32, i32
  }
}

</mosaic_0001>

<bundles_post_ra>
// kernel: transformer_encoder.1
= control target key start
LH: loop header
LB: loop body
LE: loop exit
PB: predicated region body
PF: predicated region fallthrough
CT: control target
= control target key end

     0   :  { %s3060_s0 = inlined_call_operand.vmem [shape: f32[16,32], index: 0, kind: input, shape index: {}]   ;;  %s3061_s1 = inlined_call_operand.vmem [shape: bf16[2,32,96], index: 1, kind: input, shape index: {}]   ;;  %s3062_s2 = inlined_call_operand.vmem [shape: f32[2,1,96], index: 2, kind: input, shape index: {}]   ;;  %s3063_s3 = inlined_call_operand.vmem [shape: bf16[2,32,32], index: 3, kind: input, shape index: {}]   ;;  %s3064_s4 = inlined_call_operand.vmem [shape: f32[2,1,32], index: 4, kind: input, shape index: {}]   ;;  %s3065_s5 = inlined_call_operand.vmem [shape: f32[2,1,32], index: 5, kind: input, shape index: {}]   ;;  %s3066_s6 = inlined_call_operand.vmem [shape: f32[2,1,32], index: 6, kind: input, shape index: {}]   ;;  %s3067_s7 = inlined_call_operand.vmem [shape: bf16[2,32,64], index: 7, kind: input, shape index: {}]   ;;  %s3068_s8 = inlined_call_operand.vmem [shape: f32[2,1,64], index: 8, kind: input, shape index: {}]   ;;  %s3069_s9 = inlined_call_operand.vmem [shape: bf16[2,64,32], index: 9, kind: input, shape index: {}]   ;;  %s3070_s10 = inlined_call_operand.vmem [shape: f32[2,1,32], index: 10, kind: input, shape index: {}]   ;;  %s3071_s11 = inlined_call_operand.vmem [shape: f32[2,1,32], index: 11, kind: input, shape index: {}]   ;;  %s3072_s12 = inlined_call_operand.vmem [shape: f32[2,1,32], index: 12, kind: input, shape index: {}]   ;;  %s3073_s13 = inlined_call_operand.hbm [shape: f32[16,32], index: 13, kind: output, shape index: {}]  }
   0x1   :  { %3076 = sst [smem:[#allocation6_spill]] %s3060_s0 }
   0x2   :  { %3077 = sst [smem:[#allocation7_spill]] %s3061_s1 }
   0x3   :  { %3078 = sst [smem:[#allocation8_spill]] %s3063_s3 }
   0x4   :  { %3079 = sst [smem:[#allocation9_spill]] %s3073_s13 }
   0x5   :  { %18 = vsyncpa [#allocation3], 0  ;;  %s2761_s25 = smov 0  }
   0x6 LB: > { %3080 = sst [smem:[#allocation5_spill]] %s2684_s25  ;;  %s2767_s26 = sadd.s32 4294967295, %s2684_s25   ;;  %s2684_s25 = sphi %s2761_s25, %s24_s25  }
   0x7   : > { %p2271_p0 = scmp.ge.s32.totalorder %s2684_s25, 1  ;;  %p477_p1 = scmp.lt.s32.totalorder %s2684_s25, 3 }
   0x9   : > { %p478_p2 = pnand %p2271_p0, %p477_p1 }
   0xa   : > { %p555_p3 = scmp.lt.s32.totalorder (!%p478_p2), %s2767_s26, 1  ;;  %s3081_s1 = sld [smem:[#allocation7_spill]] (!%p478_p2) }
   0xb   : > { %481 = sbr.rel (%p478_p2) target bundleno = 2570 (0xa0a), region = 72  ;;  %s3082_s3 = sld [smem:[#allocation8_spill]] (!%p478_p2) }
   0xc   : > { %p2280_p4 = scmp.ne.s32.totalorder (!%p478_p2), %s2767_s26, 0 }
  0x10   : > { %s2773_s27 = scalar_select %p555_p3, %s2767_s26, 1 }
  0x11   : > { %s3083_s21 = sld [smem:[#allocation6_spill]] (!%p2280_p4) }
  0x12   : > { %s2323_s28 = sshll.u32 %s2773_s27, 4  ;;  %s592_s0 = scalar_lea.vmem %s3070_s10, %s2773_s27 }
  0x13   : > { %s559_s17 = scalar_lea.vmem %s3081_s1, %s2323_s28  ;;  %s2786_s20 = scalar_lea.vmem %s3082_s3, %s2323_s28 }
  0x14   : > { %s2803_s16 = scalar_lea.vmem %s3067_s7, %s2323_s28  ;;  %s584_s1 = scalar_lea.vmem %s3068_s8, %s2773_s27 }
  0x15   : > { %s2326_s3 = sshll.u32 %s2773_s27, 5  ;;  %s595_s14 = scalar_lea.vmem %s3071_s11, %s2773_s27 }
  0x16   : > { %s2813_s23 = scalar_lea.vmem %s3069_s9, %s2326_s3  ;;  %s598_s13 = scalar_lea.vmem %s3072_s12, %s2773_s27 }
  0x17   : > { %603 = sbr.rel (%p2280_p4) target bundleno = 30 (0x1e), region = 76 }
  0x1c   : > { %v604_v0 = vld [vmem:[%s3083_s21] sm:$0xff]  ;;  %vm606_vm0 = vcmask 261120   ;;  %v605_v1 = vld [vmem:[%s3083_s21 + $0x8] sm:$0xff] }
  0x1d   : > { %607 = vst.msk [vmem:[#allocation2] sm:$0xff] %vm606_vm0, %v604_v0  ;;  %608 = vst.msk [vmem:[#allocation2 + $0x8] sm:$0xff] %vm606_vm0, %v605_v1 }
  0x1e PF: > { %v2600_v2 = vld [vmem:[%s559_s17 + $0x8] sm:$0xff]   ;;  %v2686_v3 = vmov 0.0   ;;  %v2601_v4 = vld [vmem:[%s559_s17] sm:$0xff]   ;;  %vm2687_vm1 = vmmov 0   ;;  %vm635_vm2 = vcmask 261120   ;;  %s3084_s25 = scalar_lea.vmem %s3062_s2, %s2773_s27  ;;  %vm780_vm3 = vcmask 1043456   ;;  %s3085_s29 = scalar_lea.vmem %s3064_s4, %s2773_s27 }
  0x1f   : > { %2373 = vmatprep.subr.bf16.mxu0 %v2686_v3  ;;  %2381 = vmatprep.subr.bf16.mxu1 %v2686_v3  ;;  %v2281_v9 = vld [vmem:[%s3084_s25] ss:$0 sm:$0xff]  ;;  %vm776_vm4 = vcmask 64512   ;;  %s3086_s15 = scalar_lea.vmem %s3065_s5, %s2773_s27  ;;  %s3087_s3 = scalar_lea.vmem %s3066_s6, %s2773_s27  ;;  %vm2019_vm5 = vcmask 523264  }
  0x20   : > { %2374 = vmatpush3.bf16.msra.mxu0 %v2600_v2  ;;  %2377 = vmatprep.mubr.msk.bf16.mxu0 %vm2687_vm1, %v2686_v3  ;;  %s2688_s24 = smov [#allocation2]   ;;  %p2509_p5 = scmp.eq.s32.totalorder %s2767_s26, 1 }
  0x21   : > { %2375 = vmatprep.subr.bf16.mxu0 %v2686_v3  ;;  %2383 = vmatprep.mubr.msk.bf16.mxu1 %vm2687_vm1, %v2686_v3 }
  0x24   : > { %v2838_v5 = vld [vmem:[#allocation2] sm:$0xff]  ;;  %v2840_v6 = vld [vmem:[#allocation2 + $0x8] sm:$0xff]  ;;  %2376 = vmatpush3.bf16.msra.mxu0 %v2601_v4 }
  0x25   : > { %v611_v7 = vpack.c.bf16 %v2840_v6, %v2838_v5  ;;  %2405 = vmatprep.subr.bf16.mxu0 %v2686_v3 }
  0x27   : > { %2378 = vmatmul.mubr.msk.bf16.vlgmr.msra.gmra.mxu0 %vm635_vm2, %v611_v7 }
  0x28   : > { %2407 = vmatprep.mubr.msk.bf16.mxu0 %vm2687_vm1, %v2686_v3 }
  0xe7   : > { %v673_v8 = vpop.f32.mrf.mxu0 }
  0xe8   : > { %v674_v12 = vadd.f32 %v2281_v9, %v673_v8 }
  0xe9   : > { %v2379_v10 = vpop.f32.mrf.mxu0 }
  0xeb   : > { %v676_v11 = vpop.f32.mrf.mxu0 }
  0xec   : > { %v677_v13 = vadd.f32 %v2281_v9, %v676_v11 }
  0xed   : > { %v2380_v14 = vpop.f32.mrf.mxu0 }
  0xee   : > { %v2525_v15 = vpack.i.bf16 %v677_v13, %v674_v12 }
  0xf0   : > { %2526 = vxpose.xlu0.b32.start.end [1/1] (short) (narrow) %v2525_v15, 96 }
 0x16c   : > { %v2527_v16 = vpop.trf.xlu0 }
 0x16d   : > { %v2528_v17 = vunpack.i.l.bf16 %v2527_v16  ;;  %v2531_v28 = vunpack.i.h.bf16 %v2527_v16 }
 0x16f   : > { %v744_v18 = vpack.c.bf16 %v2528_v17, %v2528_v17  ;;  %v748_v32 = vpack.c.bf16 %v2531_v28, %v2531_v28 }
 0x170   : > { %v2532_v19 = vpop.trf.xlu0 }
 0x171   : > { %760 = vxpose.xlu0.c.b16.start.end [1/1] (short) (narrow) %v744_v18, 16  ;;  %v2533_v20 = vunpack.i.l.bf16 %v2532_v19  ;;  %v2536_v33 = vunpack.i.h.bf16 %v2532_v19 }
 0x173   : > { %v745_v21 = vpack.c.bf16 %v2533_v20, %v2533_v20  ;;  %v749_v41 = vpack.c.bf16 %v2536_v33, %v2536_v33 }
 0x174   : > { %v2537_v22 = vpop.trf.xlu0 }
 0x175   : > { %824 = vxpose.xlu1.c.b16.start.end [1/1] (short) (narrow) %v745_v21, 16  ;;  %v2538_v23 = vunpack.i.l.bf16 %v2537_v22  ;;  %v2541_v42 = vunpack.i.h.bf16 %v2537_v22 }
 0x177   : > { %v746_v24 = vpack.c.bf16 %v2538_v23, %v2538_v23  ;;  %v750_v50 = vpack.c.bf16 %v2541_v42, %v2541_v42 }
 0x178   : > { %v2542_v25 = vpop.trf.xlu0 }
 0x179   : > { %886 = vxpose.xlu1.c.b16.start.end [1/1] (short) (narrow) %v746_v24, 16  ;;  %v2543_v26 = vunpack.i.l.bf16 %v2542_v25  ;;  %v2546_v51 = vunpack.i.h.bf16 %v2542_v25 }
 0x17b   : > { %v747_v27 = vpack.c.bf16 %v2543_v26, %v2543_v26  ;;  %v751_v59 = vpack.c.bf16 %v2546_v51, %v2546_v51 }
 0x17c   : > { %v2547_v29 = vpop.trf.xlu0 }
 0x17d   : > { %948 = vxpose.xlu1.c.b16.start.end [1/1] (short) (narrow) %v747_v27, 16  ;;  %v2551_v30 = vunpack.i.h.bf16 %v2547_v29  ;;  %v2548_v31 = vunpack.i.l.bf16 %v2547_v29 }
 0x17f   : > { %v752_v34 = vpack.c.bf16 %v2548_v31, %v2548_v31  ;;  %v756_v35 = vpack.c.bf16 %v2551_v30, %v2551_v30 }
 0x180   : > { %v2552_v36 = vpop.trf.xlu0 }
 0x181   : > { %1010 = vxpose.xlu1.c.b16.start.end [1/1] (short) (narrow) %v748_v32, 16  ;;  %v2556_v37 = vunpack.i.h.bf16 %v2552_v36  ;;  %v2553_v38 = vunpack.i.l.bf16 %v2552_v36  ;;  %v782_v39 = vsel %vm780_vm3, %v752_v34, 0  ;;  %v1030_v40 = vsel %vm780_vm3, %v756_v35, 0 }
 0x182   : > { %2382 = vmatpush3.bf16.msra.mxu1 %v782_v39  ;;  %2406 = vmatpush3.bf16.msra.mxu0 %v1030_v40 }
 0x183   : > { %v753_v43 = vpack.c.bf16 %v2553_v38, %v2553_v38  ;;  %v757_v44 = vpack.c.bf16 %v2556_v37, %v2556_v37  ;;  %2387 = vmatprep.subr.bf16.mxu1 %v2686_v3  ;;  %2417 = vmatprep.subr.bf16.mxu0 %v2686_v3 }
 0x184   : > { %v2557_v45 = vpop.trf.xlu0 }
 0x185   : > { %1072 = vxpose.xlu1.c.b16.start.end [1/1] (short) (narrow) %v749_v41, 16  ;;  %v2561_v46 = vunpack.i.h.bf16 %v2557_v45  ;;  %v2558_v47 = vunpack.i.l.bf16 %v2557_v45  ;;  %v844_v48 = vsel %vm780_vm3, %v753_v43, 0  ;;  %v1092_v49 = vsel %vm780_vm3, %v757_v44, 0 }
 0x187   : > { %v754_v52 = vpack.c.bf16 %v2558_v47, %v2558_v47  ;;  %v758_v53 = vpack.c.bf16 %v2561_v46, %v2561_v46 }
 0x188   : > { %v2562_v54 = vpop.trf.xlu0 }
 0x189   : > { %1134 = vxpose.xlu1.c.b16.start.end [1/1] (short) (narrow) %v750_v50, 16  ;;  %v2566_v55 = vunpack.i.h.bf16 %v2562_v54  ;;  %v2563_v56 = vunpack.i.l.bf16 %v2562_v54  ;;  %v906_v57 = vsel %vm780_vm3, %v754_v52, 0  ;;  %v1154_v58 = vsel %vm780_vm3, %v758_v53, 0 }
 0x18b   : > { %v755_v60 = vpack.c.bf16 %v2563_v56, %v2563_v56  ;;  %v759_v61 = vpack.c.bf16 %v2566_v55, %v2566_v55 }
 0x18c   : > { %v2864_v62 = vpop.trf.xlu0 }
 0x18d   : > { %1196 = vxpose.xlu1.c.b16.start.end [1/1] (short) (narrow) %v751_v59, 16  ;;  %v968_v63 = vsel %vm780_vm3, %v755_v60, 0  ;;  %v1216_v0 = vsel %vm780_vm3, %v759_v61, 0 }
 0x190   : > { %v2868_v1 = vpop.trf.xlu0 }
 0x194   : > { %v2870_v2 = vpop.trf.xlu0 }
 0x198   : > { %v2872_v4 = vpop.trf.xlu0 }
 0x1d3   : > { %v768_v7 = vpop.trf.xlu0 }
 0x1d4   : > { %2384 = vmatmul.mubr.msk.bf16.vlgmr.msra.gmra.mxu1 %vm776_vm4, %v768_v7 }
 0x1d5   : > { %2388 = vmatpush3.bf16.msra.mxu1 %v844_v48  ;;  %2389 = vmatprep.mubr.msk.bf16.mxu1 %vm2687_vm1, %v2686_v3 }
 0x1d6   : > { %2393 = vmatprep.subr.bf16.mxu1 %v2686_v3 }
 0x1d7   : > { %v832_v8 = vpop.trf.xlu1 }
 0x1db   : > { %v894_v9 = vpop.trf.xlu1 }
 0x1dc   : > { %2390 = vmatmul.mubr.msk.bf16.vlgmr.msra.gmra.mxu1 %vm776_vm4, %v832_v8 }
 0x1dd   : > { %2394 = vmatpush3.bf16.msra.mxu1 %v906_v57  ;;  %2395 = vmatprep.mubr.msk.bf16.mxu1 %vm2687_vm1, %v2686_v3 }
 0x1de   : > { %2399 = vmatprep.subr.bf16.mxu1 %v2686_v3 }
 0x1df   : > { %v956_v10 = vpop.trf.xlu1 }
 0x1e3   : > { %v1018_v11 = vpop.trf.xlu1 }
 0x1e4   : > { %2396 = vmatmul.mubr.msk.bf16.vlgmr.msra.gmra.mxu1 %vm776_vm4, %v894_v9  ;;  %2408 = vmatmul.mubr.msk.bf16.vlgmr.msra.gmra.mxu0 %vm776_vm4, %v1018_v11 }
 0x1e5   : > { %2400 = vmatpush3.bf16.msra.mxu1 %v968_v63  ;;  %2418 = vmatpush3.bf16.msra.mxu0 %v1154_v58 }
 0x1e6   : > { %2401 = vmatprep.mubr.msk.bf16.mxu1 %vm2687_vm1, %v2686_v3  ;;  %2411 = vmatprep.subr.bf16.mxu1 %v2686_v3 }
 0x1e7   : > { %v1080_v12 = vpop.trf.xlu1  ;;  %2419 = vmatprep.mubr.msk.bf16.mxu0 %vm2687_vm1, %v2686_v3  ;;  %2429 = vmatprep.subr.bf16.mxu0 %v2686_v3 }
 0x1eb   : > { %v1142_v13 = vpop.trf.xlu1 }
 0x1ec   : > { %2402 = vmatmul.mubr.msk.bf16.vlgmr.msra.gmra.mxu1 %vm776_vm4, %v956_v10  ;;  %2420 = vmatmul.mubr.msk.bf16.vlgmr.msra.gmra.mxu0 %vm776_vm4, %v1142_v13 }
 0x1ed   : > { %2412 = vmatpush3.bf16.msra.mxu1 %v1092_v49  ;;  %2413 = vmatprep.mubr.msk.bf16.mxu1 %vm2687_vm1, %v2686_v3 }
 0x1ee   : > { %2423 = vmatprep.subr.bf16.mxu1 %v2686_v3  ;;  %2431 = vmatprep.mubr.msk.bf16.mxu0 %vm2687_vm1, %v2686_v3 }
 0x1ef   : > { %v1204_v14 = vpop.trf.xlu1 }
 0x1f4   : > { %2414 = vmatmul.mubr.msk.bf16.vlgmr.msra.gmra.mxu1 %vm776_vm4, %v1080_v12 }
 0x1f5   : > { %2424 = vmatpush3.bf16.msra.mxu1 %v1216_v0  ;;  %2425 = vmatprep.mubr.msk.bf16.mxu1 %vm2687_vm1, %v2686_v3 }
 0x1f6   : > { %2435 = vmatprep.subr.bf16.mxu1 %v2686_v3 }
 0x1fc   : > { %2426 = vmatmul.mubr.msk.bf16.vlgmr.msra.gmra.mxu1 %vm776_vm4, %v1204_v14 }
 0x1fd   : > { %2437 = vmatprep.mubr.msk.bf16.mxu1 %vm2687_vm1, %v2686_v3 }
 0x294   : > { %v818_v15 = vpop.f32.mrf.mxu1 }
 0x295   : > { %v1258_v16 = vsel %vm776_vm4, %v818_v15, -inf }
 0x296   : > { %1259 = vmax.xlane.f32.xlu1 %v1258_v16  ;;  %v2385_v17 = vpop.f32.mrf.mxu1 }
 0x298   : > { %v821_v18 = vpop.f32.mrf.mxu1 }
 0x29a   : > { %v2386_v19 = vpop.f32.mrf.mxu1 }
 0x29c   : > { %v880_v20 = vpop.f32.mrf.mxu1 }
 0x29d   : > { %v1261_v21 = vsel %vm776_vm4, %v880_v20, -inf }
 0x29e   : > { %1262 = vmax.xlane.f32.xlu1 %v1261_v21  ;;  %v2391_v22 = vpop.f32.mrf.mxu1 }
 0x2a0   : > { %v883_v23 = vpop.f32.mrf.mxu1 }
 0x2a2   : > { %v2392_v24 = vpop.f32.mrf.mxu1 }
 0x2a4   : > { %v942_v25 = vpop.f32.mrf.mxu1  ;;  %v1066_v26 = vpop.f32.mrf.mxu0 }
 0x2a5   : > { %v1264_v27 = vsel %vm776_vm4, %v942_v25, -inf  ;;  %v1270_v39 = vsel %vm776_vm4, %v1066_v26, -inf }
 0x2a6   : > { %1265 = vmax.xlane.f32.xlu1 %v1264_v27  ;;  %v2397_v28 = vpop.f32.mrf.mxu1  ;;  %v2409_v29 = vpop.f32.mrf.mxu0 }
 0x2a8   : > { %v945_v30 = vpop.f32.mrf.mxu1  ;;  %v1069_v31 = vpop.f32.mrf.mxu0 }
 0x2aa   : > { %v2398_v32 = vpop.f32.mrf.mxu1  ;;  %v2410_v33 = vpop.f32.mrf.mxu0 }
 0x2ac   : > { %v1004_v34 = vpop.f32.mrf.mxu1  ;;  %v1190_v35 = vpop.f32.mrf.mxu0 }
 0x2ad   : > { %v1267_v36 = vsel %vm776_vm4, %v1004_v34, -inf  ;;  %v1276_v47 = vsel %vm776_vm4, %v1190_v35, -inf }
 0x2ae   : > { %1268 = vmax.xlane.f32.xlu1 %v1267_v36  ;;  %v2403_v37 = vpop.f32.mrf.mxu1  ;;  %v2421_v38 = vpop.f32.mrf.mxu0 }
 0x2b0   : > { %v1007_v40 = vpop.f32.mrf.mxu1  ;;  %v1193_v41 = vpop.f32.mrf.mxu0 }
 0x2b2   : > { %v2404_v42 = vpop.f32.mrf.mxu1  ;;  %1271 = vmax.xlane.f32.xlu1 %v1270_v39  ;;  %v2422_v43 = vpop.f32.mrf.mxu0 }
 0x2b4   : > { %v1128_v44 = vpop.f32.mrf.mxu1 }
 0x2b5   : > { %v1273_v45 = vsel %vm776_vm4, %v1128_v44, -inf }
 0x2b6   : > { %v2415_v46 = vpop.f32.mrf.mxu1  ;;  %1274 = vmax.xlane.f32.xlu1 %v1273_v45  ;;  %v2568_v45 = vunpack.i.l.bf16 %v2864_v62 }
 0x2b8   : > { %v1131_v48 = vpop.f32.mrf.mxu1 }
 0x2ba   : > { %v2416_v49 = vpop.f32.mrf.mxu1  ;;  %1277 = vmax.xlane.f32.xlu1 %v1276_v47 }
 0x2bb   : > { %v1346_v49 = vpack.c.bf16 %v2568_v45, %v2568_v45 }
 0x2bc   : > { %v1252_v50 = vpop.f32.mrf.mxu1 }
 0x2bd   : > { %v1279_v51 = vsel %vm776_vm4, %v1252_v50, -inf }
 0x2be   : > { %v2427_v52 = vpop.f32.mrf.mxu1  ;;  %1280 = vmax.xlane.f32.xlu1 %v1279_v51 }
 0x2c0   : > { %v1255_v53 = vpop.f32.mrf.mxu1 }
 0x2c1   : > { %v2573_v53 = vunpack.i.l.bf16 %v2868_v1 }
 0x2c2   : > { %v2428_v54 = vpop.f32.mrf.mxu1 }
 0x31f   : > { %v1260_v55 = vpop.xlane.xlu1 %1259 }
 0x320   : > { %v1282_v56 = vsub.f32 %v818_v15, %v1260_v55 }
 0x322   : > { %v1290_v57 = vmul.f32 1.442695, %v1282_v56 }
 0x324   : > { %2610 = vpow2.f32 %v1290_v57  ;;  %v1347_v57 = vpack.c.bf16 %v2573_v53, %v2573_v53 }
 0x327   : > { %v1263_v58 = vpop.xlane.xlu1 %1262 }
 0x328   : > { %v1283_v59 = vsub.f32 %v880_v20, %v1263_v58 }
 0x32a   : > { %v1292_v60 = vmul.f32 1.442695, %v1283_v59 }
 0x32c   : > { %2612 = vpow2.f32 %v1292_v60 }
 0x32f   : > { %v1266_v61 = vpop.xlane.xlu1 %1265 }
 0x330   : > { %v1284_v63 = vsub.f32 %v942_v25, %v1266_v61  ;;  %v2578_v61 = vunpack.i.l.bf16 %v2870_v2 }
 0x331   : > { %v2611_v0 = vpop.eup %2610 }
 0x332   : > { %v1294_v7 = vmul.f32 1.442695, %v1284_v63  ;;  %v1306_v8 = vsel %vm776_vm4, %v2611_v0, 0.0 }
 0x333   : > { %1307 = vadd.xlane.f32.xlu1 %v1306_v8  ;;  %v1348_v8 = vpack.c.bf16 %v2578_v61, %v2578_v61 }
 0x334   : > { %2614 = vpow2.f32 %v1294_v7 }
 0x337   : > { %v1269_v9 = vpop.xlane.xlu1 %1268 }
 0x338   : > { %v1285_v10 = vsub.f32 %v1004_v34, %v1269_v9 }
 0x339   : > { %v2613_v11 = vpop.eup %2612 }
 0x33a   : > { %v1296_v12 = vmul.f32 1.442695, %v1285_v10  ;;  %v1309_v13 = vsel %vm776_vm4, %v2613_v11, 0.0 }
 0x33b   : > { %v1272_v14 = vpop.xlane.xlu1 %1271  ;;  %1310 = vadd.xlane.f32.xlu1 %v1309_v13  ;;  %v2583_v13 = vunpack.i.l.bf16 %v2872_v4 }
 0x33c   : > { %2616 = vpow2.f32 %v1296_v12  ;;  %v1286_v15 = vsub.f32 %v1066_v26, %v1272_v14 }
 0x33e   : > { %v1298_v16 = vmul.f32 1.442695, %v1286_v15 }
 0x33f   : > { %v1275_v17 = vpop.xlane.xlu1 %1274 }
 0x340   : > { %2618 = vpow2.f32 %v1298_v16  ;;  %v1287_v18 = vsub.f32 %v1128_v44, %v1275_v17 }
 0x341   : > { %v2615_v19 = vpop.eup %2614 }
 0x342   : > { %v1300_v20 = vmul.f32 1.442695, %v1287_v18  ;;  %v1312_v21 = vsel %vm776_vm4, %v2615_v19, 0.0  ;;  %v2571_v18 = vunpack.i.h.bf16 %v2864_v62 }
 0x343   : > { %1313 = vadd.xlane.f32.xlu1 %v1312_v21  ;;  %v1278_v22 = vpop.xlane.xlu1 %1277 }
 0x344   : > { %2620 = vpow2.f32 %v1300_v20  ;;  %v1288_v23 = vsub.f32 %v1190_v35, %v1278_v22 }
 0x346   : > { %v1302_v24 = vmul.f32 1.442695, %v1288_v23 }
 0x347   : > { %v1281_v25 = vpop.xlane.xlu1 %1280 }
 0x348   : > { %2622 = vpow2.f32 %v1302_v24  ;;  %v1289_v27 = vsub.f32 %v1252_v50, %v1281_v25  ;;  %v1350_v24 = vpack.c.bf16 %v2571_v18, %v2571_v18  ;;  %v2576_v25 = vunpack.i.h.bf16 %v2868_v1  ;;  %v2301_v18 = vld [vmem:[%s3085_s29] ss:$0 sm:$0xff]  ;;  %s2118_s29 = sshll.u32 %s2688_s24, 4  ;;  %s2119_s29 = int_to_ptr.vmem [resolvable:$true] %s2118_s29 }
 0x349   : > { %v2617_v28 = vpop.eup %2616  ;;  %p2657_p9 = scmp.lt.s32.totalorder %s2119_s29, %s2119_s29 }
 0x34a   : > { %v1304_v29 = vmul.f32 1.442695, %v1289_v27  ;;  %v1315_v26 = vsel %vm776_vm4, %v2617_v28, 0.0 }
 0x34b   : > { %1316 = vadd.xlane.f32.xlu1 %v1315_v26  ;;  %v1351_v26 = vpack.c.bf16 %v2576_v25, %v2576_v25 }
 0x34c   : > { %2624 = vpow2.f32 %v1304_v29 }
 0x34d   : > { %v2619_v30 = vpop.eup %2618 }
 0x34e   : > { %v1318_v31 = vsel %vm776_vm4, %v2619_v30, 0.0 }
 0x34f   : > { %1319 = vadd.xlane.f32.xlu0 %v1318_v31 }
 0x351   : > { %v2917_v32 = vpop.eup %2620 }
 0x352   : > { %v1321_v33 = vsel %vm776_vm4, %v2917_v32, 0.0 }
 0x353   : > { %1322 = vadd.xlane.f32.xlu1 %v1321_v33  ;;  %v2586_v33 = vunpack.i.h.bf16 %v2872_v4 }
 0x355   : > { %v2921_v34 = vpop.eup %2622 }
 0x356   : > { %v1324_v35 = vsel %vm776_vm4, %v2921_v34, 0.0 }
 0x357   : > { %1325 = vadd.xlane.f32.xlu1 %v1324_v35 }
 0x359   : > { %v2925_v36 = vpop.eup %2624 }
 0x35a   : > { %v1327_v37 = vsel %vm776_vm4, %v2925_v36, 0.0 }
 0x35b   : > { %1328 = vadd.xlane.f32.xlu1 %v1327_v37 }
 0x3bc   : > { %v1308_v38 = vpop.xlane.xlu1 %1307 }
 0x3bd   : > { %2626 = vrcp.f32 %v1308_v38 }
 0x3c4   : > { %v1311_v39 = vpop.xlane.xlu1 %1310 }
 0x3c5   : > { %2628 = vrcp.f32 %v1311_v39 }
 0x3ca   : > { %v2627_v40 = vpop.eup %2626 }
 0x3cb   : > { %v1338_v41 = vmul.f32 %v2627_v40, %v2611_v0 }
 0x3cc   : > { %v1314_v42 = vpop.xlane.xlu1 %1313 }
 0x3cd   : > { %2630 = vrcp.f32 %v1314_v42  ;;  %v1354_v43 = vpack.c.bf16 %v1338_v41, %v1338_v41 }
 0x3cf   : > { %v1366_v44 = vsel %vm776_vm4, %v1354_v43, 0 }
 0x3d0   : > { %2430 = vmatpush3.bf16.xpose.msra.mxu0 %v1366_v44 }
 0x3d1   : > { %2441 = vmatprep.subr.bf16.mxu0 %v2686_v3 }
 0x3d2   : > { %v2629_v46 = vpop.eup %2628 }
 0x3d3   : > { %v1339_v47 = vmul.f32 %v2629_v46, %v2613_v11 }
 0x3d4   : > { %v1317_v48 = vpop.xlane.xlu1 %1316 }
 0x3d5   : > { %2632 = vrcp.f32 %v1317_v48  ;;  %v1355_v50 = vpack.c.bf16 %v1339_v47, %v1339_v47 }
 0x3d7   : > { %2432 = vmatmul.mubr.msk.bf16.vlgmr.msra.gmra.mxu0 %vm776_vm4, %v1346_v49  ;;  %v1412_v51 = vsel %vm776_vm4, %v1355_v50, 0  ;;  %v2603_v50 = vld [vmem:[%s2786_s20] sm:$0xff]  }
 0x3d8   : > { %v1320_v52 = vpop.xlane.xlu0 %1319  ;;  %2436 = vmatpush3.bf16.xpose.msra.mxu1 %v1412_v51  ;;  %2443 = vmatprep.mubr.msk.bf16.mxu0 %vm2687_vm1, %v2686_v3 }
 0x3d9   : > { %2634 = vrcp.f32 %v1320_v52  ;;  %2447 = vmatprep.subr.bf16.mxu1 %v2686_v3 }
 0x3da   : > { %v2631_v54 = vpop.eup %2630 }
 0x3db   : > { %v1340_v55 = vmul.f32 %v2631_v54, %v2615_v19  ;;  %v1349_v19 = vpack.c.bf16 %v2583_v13, %v2583_v13 }
 0x3dc   : > { %v1323_v56 = vpop.xlane.xlu1 %1322 }
 0x3dd   : > { %2636 = vrcp.f32 %v1323_v56  ;;  %v1356_v58 = vpack.c.bf16 %v1340_v55, %v1340_v55 }
 0x3df   : > { %2438 = vmatmul.mubr.msk.bf16.vlgmr.msra.gmra.mxu1 %vm776_vm4, %v1347_v57  ;;  %v1458_v59 = vsel %vm776_vm4, %v1356_v58, 0 }
 0x3e0   : > { %2442 = vmatpush3.bf16.xpose.msra.mxu0 %v1458_v59  ;;  %v1326_v60 = vpop.xlane.xlu1 %1325  ;;  %2449 = vmatprep.mubr.msk.bf16.mxu1 %vm2687_vm1, %v2686_v3 }
 0x3e1   : > { %2638 = vrcp.f32 %v1326_v60  ;;  %2453 = vmatprep.subr.bf16.mxu0 %v2686_v3 }
 0x3e2   : > { %v2633_v63 = vpop.eup %2632 }
 0x3e3   : > { %v1341_v0 = vmul.f32 %v2633_v63, %v2617_v28 }
 0x3e4   : > { %v1329_v7 = vpop.xlane.xlu1 %1328 }
 0x3e5   : > { %2640 = vrcp.f32 %v1329_v7  ;;  %v1357_v9 = vpack.c.bf16 %v1341_v0, %v1341_v0 }
 0x3e6   : > { %v2635_v10 = vpop.eup %2634 }
 0x3e7   : > { %2444 = vmatmul.mubr.msk.bf16.vlgmr.msra.gmra.mxu0 %vm776_vm4, %v1348_v8  ;;  %v1504_v11 = vsel %vm776_vm4, %v1357_v9, 0  ;;  %v1342_v12 = vmul.f32 %v2635_v10, %v2619_v30  ;;  %v2581_v30 = vunpack.i.h.bf16 %v2870_v2  ;;  %v1353_v2 = vpack.c.bf16 %v2586_v33, %v2586_v33 }
 0x3e8   : > { %2448 = vmatpush3.bf16.xpose.msra.mxu1 %v1504_v11  ;;  %2455 = vmatprep.mubr.msk.bf16.mxu0 %vm2687_vm1, %v2686_v3 }
 0x3e9   : > { %v1358_v14 = vpack.c.bf16 %v1342_v12, %v1342_v12  ;;  %2459 = vmatprep.subr.bf16.mxu1 %v2686_v3 }
 0x3ea   : > { %v2637_v15 = vpop.eup %2636 }
 0x3eb   : > { %v1550_v16 = vsel %vm776_vm4, %v1358_v14, 0  ;;  %v1343_v17 = vmul.f32 %v2637_v15, %v2917_v32  ;;  %v1352_v32 = vpack.c.bf16 %v2581_v30, %v2581_v30 }
 0x3ec   : > { %2454 = vmatpush3.bf16.xpose.msra.mxu0 %v1550_v16 }
 0x3ed   : > { %v1359_v20 = vpack.c.bf16 %v1343_v17, %v1343_v17  ;;  %2465 = vmatprep.subr.bf16.mxu0 %v2686_v3 }
 0x3ee   : > { %v2639_v21 = vpop.eup %2638 }
 0x3ef   : > { %2450 = vmatmul.mubr.msk.bf16.vlgmr.msra.gmra.mxu1 %vm776_vm4, %v1349_v19  ;;  %v1596_v22 = vsel %vm776_vm4, %v1359_v20, 0  ;;  %v1344_v23 = vmul.f32 %v2639_v21, %v2921_v34  ;;  %v2602_v34 = vld [vmem:[%s2786_s20 + $0x8] sm:$0xff]  }
 0x3f0   : > { %2460 = vmatpush3.bf16.xpose.msra.mxu1 %v1596_v22  ;;  %2461 = vmatprep.mubr.msk.bf16.mxu1 %vm2687_vm1, %v2686_v3 }
 0x3f1   : > { %v1360_v27 = vpack.c.bf16 %v1344_v23, %v1344_v23  ;;  %2471 = vmatprep.subr.bf16.mxu1 %v2686_v3 }
 0x3f2   : > { %v2641_v62 = vpop.eup %2640 }
 0x3f3   : > { %2456 = vmatmul.mubr.msk.bf16.vlgmr.msra.gmra.mxu0 %vm776_vm4, %v1350_v24  ;;  %v1642_v28 = vsel %vm776_vm4, %v1360_v27, 0  ;;  %v1345_v29 = vmul.f32 %v2641_v62, %v2925_v36 }
 0x3f4   : > { %2466 = vmatpush3.bf16.xpose.msra.mxu0 %v1642_v28  ;;  %2467 = vmatprep.mubr.msk.bf16.mxu0 %vm2687_vm1, %v2686_v3 }
 0x3f5   : > { %v1361_v31 = vpack.c.bf16 %v1345_v29, %v1345_v29  ;;  %2477 = vmatprep.subr.bf16.mxu0 %v2686_v3 }
 0x3f7   : > { %2462 = vmatmul.mubr.msk.bf16.vlgmr.msra.gmra.mxu1 %vm776_vm4, %v1351_v26  ;;  %v1688_v1 = vsel %vm776_vm4, %v1361_v31, 0 }
 0x3f8   : > { %2472 = vmatpush3.bf16.xpose.msra.mxu1 %v1688_v1  ;;  %2473 = vmatprep.mubr.msk.bf16.mxu1 %vm2687_vm1, %v2686_v3 }
 0x3f9   : > { %2485 = vmatprep.subr.bf16.mxu1 %v2686_v3 }
 0x3fb   : > { %2468 = vmatmul.mubr.msk.bf16.vlgmr.msra.gmra.mxu0 %vm776_vm4, %v1352_v32 }
 0x3fc   : > { %2481 = vmatprep.mubr.msk.bf16.mxu0 %vm2687_vm1, %v2686_v3  ;;  %2478 = vmatpush3.bf16.msra.mxu0 %v2602_v34 }
 0x3fd   : > { %2479 = vmatprep.subr.bf16.mxu0 %v2686_v3 }
 0x3ff   : > { %2474 = vmatmul.mubr.msk.bf16.vlgmr.msra.gmra.mxu1 %vm776_vm4, %v1353_v2 }
 0x400   : > { %2489 = vmatprep.mubr.msk.bf16.mxu1 %vm2687_vm1, %v2686_v3  ;;  %2480 = vmatpush3.bf16.msra.mxu0 %v2603_v50 }
 0x401   : > { %2493 = vmatprep.subr.bf16.mxu0 %v2686_v3 }
 0x497   : > { %v1402_v35 = vpop.f32.mrf.mxu0 }
 0x499   : > { %v2433_v4 = vpop.f32.mrf.mxu0 }
 0x49a   : > { %v2606_v4 = vld [vmem:[%s2813_s23 + $0x18] sm:$0xff]  }
 0x49b   : > { %v1405_v36 = vpop.f32.mrf.mxu0 }
 0x49d   : > { %v2434_v37 = vpop.f32.mrf.mxu0 }
 0x49f   : > { %v1448_v38 = vpop.f32.mrf.mxu1 }
 0x4a1   : > { %v2439_v39 = vpop.f32.mrf.mxu1 }
 0x4a3   : > { %v1451_v40 = vpop.f32.mrf.mxu1 }
 0x4a5   : > { %v2440_v41 = vpop.f32.mrf.mxu1 }
 0x4a7   : > { %v1494_v42 = vpop.f32.mrf.mxu0 }
 0x4a9   : > { %v2445_v43 = vpop.f32.mrf.mxu0 }
 0x4ab   : > { %v1497_v44 = vpop.f32.mrf.mxu0 }
 0x4ac   : > { %v2305_v44 = vld [vmem:[%s3086_s15] ss:$0 sm:$0xff] }
 0x4ad   : > { %v2446_v45 = vpop.f32.mrf.mxu0 }
 0x4af   : > { %v1540_v46 = vpop.f32.mrf.mxu1 }
 0x4b1   : > { %v2451_v47 = vpop.f32.mrf.mxu1 }
 0x4b3   : > { %v1543_v48 = vpop.f32.mrf.mxu1  ;;  %v1586_v49 = vpop.f32.mrf.mxu0 }
 0x4b4   : > { %v2587_v51 = vpack.i.bf16 %v1586_v49, %v1402_v35  ;;  %v2605_v35 = vld [vmem:[%s2803_s16] sm:$0xff]  }
 0x4b5   : > { %v2452_v52 = vpop.f32.mrf.mxu1  ;;  %v2457_v53 = vpop.f32.mrf.mxu0  ;;  %v2306_v48 = vld [vmem:[%s3087_s3] ss:$0 sm:$0xff] }
 0x4b6   : > { %2588 = vxpose.xlu0.b32.start [1/4] (short) (narrow) %v2587_v51, 8  ;;  %v2607_v53 = vld [vmem:[%s2813_s23 + $0x10] sm:$0xff]  }
 0x4b7   : > { %v1589_v54 = vpop.f32.mrf.mxu0  ;;  %v1632_v55 = vpop.f32.mrf.mxu1 }
 0x4b8   : > { %v2589_v56 = vpack.i.bf16 %v1632_v55, %v1448_v38  ;;  %v2608_v54 = vld [vmem:[%s2813_s23 + $0x8] sm:$0xff]   ;;  %v2609_v55 = vld [vmem:[%s2813_s23] sm:$0xff]  }
 0x4b9   : > { %v2458_v57 = vpop.f32.mrf.mxu0  ;;  %v2463_v58 = vpop.f32.mrf.mxu1 }
 0x4ba   : > { %2590 = vxpose.xlu0.b32.cont [2/4] (short) (narrow) %v2589_v56, 8  ;;  %v2307_v56 = vld [vmem:[%s584_s1] ss:$0 sm:$0xff] }
 0x4bb   : > { %v1635_v59 = vpop.f32.mrf.mxu1  ;;  %v1678_v60 = vpop.f32.mrf.mxu0 }
 0x4bc   : > { %v2591_v61 = vpack.i.bf16 %v1678_v60, %v1494_v42 }
 0x4bd   : > { %v2464_v63 = vpop.f32.mrf.mxu1  ;;  %v2469_v0 = vpop.f32.mrf.mxu0 }
 0x4be   : > { %2592 = vxpose.xlu0.b32.cont [3/4] (short) (narrow) %v2591_v61, 8 }
 0x4bf   : > { %v1681_v7 = vpop.f32.mrf.mxu0  ;;  %v1724_v8 = vpop.f32.mrf.mxu1 }
 0x4c0   : > { %v2593_v9 = vpack.i.bf16 %v1724_v8, %v1540_v46 }
 0x4c1   : > { %v2470_v10 = vpop.f32.mrf.mxu0  ;;  %v2475_v11 = vpop.f32.mrf.mxu1 }
 0x4c2   : > { %2594 = vxpose.xlu0.b32.end [4/4] (short) (narrow) %v2593_v9, 8 }
 0x4c3   : > { %v1727_v12 = vpop.f32.mrf.mxu1 }
 0x4c5   : > { %v2476_v13 = vpop.f32.mrf.mxu1 }
 0x532   : > { %v2595_v14 = vpop.trf.xlu0 }
 0x533   : > { %v2599_v15 = vunpack.i.h.bf16 %v2595_v14  ;;  %v2596_v16 = vunpack.i.l.bf16 %v2595_v14 }
 0x535   : > { %v1794_v17 = vpack.c.bf16 %v2599_v15, %v2596_v16 }
 0x537   : > { %2482 = vmatmul.mubr.msk.bf16.vlgmr.msra.gmra.mxu0 %vm635_vm2, %v1794_v17 }
 0x538   : > { %2501 = vmatprep.mubr.msk.bf16.mxu0 %vm2687_vm1, %v2686_v3  ;;  %2494 = vmatpush3.bf16.msra.mxu0 %v2606_v4 }
 0x539   : > { %2495 = vmatprep.subr.bf16.mxu0 %v2686_v3 }
 0x53c   : > { %2496 = vmatpush3.bf16.msra.mxu0 %v2607_v53 }
 0x53d   : > { %2497 = vmatprep.subr.bf16.mxu0 %v2686_v3 }
 0x540   : > { %2498 = vmatpush3.bf16.msra.mxu0 %v2608_v54 }
 0x541   : > { %2499 = vmatprep.subr.bf16.mxu0 %v2686_v3 }
 0x544   : > { %2500 = vmatpush3.bf16.msra.mxu0 %v2609_v55 }
 0x5f7   : > { %v1855_v19 = vpop.f32.mrf.mxu0 }
 0x5f8   : > { %v1856_v20 = vadd.f32 %v2301_v18, %v1855_v19 }
 0x5f9   : > { %v2483_v21 = vpop.f32.mrf.mxu0 }
 0x5fa   : > { %v1862_v22 = vadd.f32 %v1856_v20, %v2838_v5 }
 0x5fb   : > { %v1858_v23 = vpop.f32.mrf.mxu0 }
 0x5fc   : > { %v1859_v24 = vadd.f32 %v2301_v18, %v1858_v23  ;;  %v1864_v25 = vsel %vm635_vm2, %v1862_v22, 0.0 }
 0x5fd   : > { %1865 = vadd.xlane.f32.xlu1 %v1864_v25  ;;  %v2484_v27 = vpop.f32.mrf.mxu0 }
 0x5fe   : > { %v1863_v62 = vadd.f32 %v1859_v24, %v2840_v6  ;;  %v2604_v6 = vld [vmem:[%s2803_s16 + $0x8] sm:$0xff]  }
 0x5ff   : > { %2486 = vmatpush3.bf16.msra.mxu1 %v2604_v6 }
 0x600   : > { %v1867_v28 = vsel %vm635_vm2, %v1863_v62, 0.0  ;;  %2487 = vmatprep.subr.bf16.mxu1 %v2686_v3  ;;  %v2311_v3 = vld [vmem:[%s592_s0] ss:$0 sm:$0xff] }
 0x601   : > { %1868 = vadd.xlane.f32.xlu1 %v1867_v28 }
 0x603   : > { %2488 = vmatpush3.bf16.msra.mxu1 %v2605_v35 }
 0x686   : > { %v1866_v29 = vpop.xlane.xlu1 %1865 }
 0x687   : > { %v1871_v26 = vmul.f32 0.03125, %v1866_v29 }
 0x689   : > { %v1873_v30 = vsub.f32 %v1862_v22, %v1871_v26 }
 0x68a   : > { %v1869_v31 = vpop.xlane.xlu1 %1868 }
 0x68b   : > { %v1872_v1 = vmul.f32 0.03125, %v1869_v31  ;;  %v1875_v5 = vmul.f32 %v1873_v30, %v1873_v30 }
 0x68d   : > { %v1874_v32 = vsub.f32 %v1863_v62, %v1872_v1  ;;  %v1877_v33 = vsel %vm635_vm2, %v1875_v5, 0.0 }
 0x68e   : > { %1878 = vadd.xlane.f32.xlu1 %v1877_v33  ;;  %v2317_v33 = vld [vmem:[%s595_s14] ss:$0 sm:$0xff]  ;;  %s2650_s14 = scalar_lea.vmem %s2119_s29, 256 }
 0x68f   : > { %v1876_v2 = vmul.f32 %v1874_v32, %v1874_v32  ;;  %p2651_p6 = scmp.ne.s32.totalorder %s2119_s29, %s2650_s14  ;;  %p2658_p10 = scmp.lt.s32.totalorder %s2650_s14, %s2650_s14 }
 0x691   : > { %v1880_v34 = vsel %vm635_vm2, %v1876_v2, 0.0  ;;  %p2652_p7 = pnand %p2651_p6, %p2509_p5  ;;  %p2659_p11 = por %p2658_p10, %p2657_p9 }
 0x692   : > { %1881 = vadd.xlane.f32.xlu1 %v1880_v34  ;;  %v2318_v34 = vld [vmem:[%s598_s13] ss:$0 sm:$0xff] }
 0x693   : > { %p2653_p8 = pneg %p2652_p7 }
 0x695   : > { %p2660_p12 = pnand %p2659_p11, %p2653_p8 }
 0x717   : > { %v1879_v36 = vpop.xlane.xlu1 %1878 }
 0x718   : > { %v1883_v37 = vmul.f32 0.03125, %v1879_v36 }
 0x71a   : > { %v1885_v38 = vadd.f32 1e-06, %v1883_v37 }
 0x71b   : > { %v1882_v39 = vpop.xlane.xlu1 %1881 }
 0x71c   : > { %2642 = vrsqrt.f32 %v1885_v38  ;;  %v1884_v40 = vmul.f32 0.03125, %v1882_v39 }
 0x71e   : > { %v1886_v41 = vadd.f32 1e-06, %v1884_v40 }
 0x720   : > { %2644 = vrsqrt.f32 %v1886_v41 }
 0x729   : > { %v2643_v42 = vpop.eup %2642 }
 0x72a   : > { %v1889_v43 = vmul.f32 %v2643_v42, %v1873_v30 }
 0x72c   : > { %v1898_v47 = vmul.f32 %v2305_v44, %v1889_v43 }
 0x72d   : > { %v2645_v45 = vpop.eup %2644 }
 0x72e   : > { %v1890_v46 = vmul.f32 %v2645_v45, %v1874_v32  ;;  %v1907_v50 = vadd.f32 %v2306_v48, %v1898_v47 }
 0x730   : > { %v1899_v49 = vmul.f32 %v2305_v44, %v1890_v46 }
 0x732   : > { %v1908_v51 = vadd.f32 %v2306_v48, %v1899_v49 }
 0x734   : > { %v1909_v52 = vpack.c.bf16 %v1908_v51, %v1907_v50 }
 0x736   : > { %2490 = vmatmul.mubr.msk.bf16.vlgmr.msra.gmra.mxu1 %vm635_vm2, %v1909_v52 }
 0x7f6   : > { %v1970_v57 = vpop.f32.mrf.mxu1 }
 0x7f7   : > { %v1971_v59 = vadd.f32 %v2307_v56, %v1970_v57 }
 0x7f8   : > { %v2491_v58 = vpop.f32.mrf.mxu1 }
 0x7f9   : > { %v1977_v0 = vmax.f32 %v1971_v59, 0.0 }
 0x7fa   : > { %v1973_v60 = vpop.f32.mrf.mxu1 }
 0x7fb   : > { %v1974_v61 = vadd.f32 %v2307_v56, %v1973_v60 }
 0x7fc   : > { %v2492_v63 = vpop.f32.mrf.mxu1 }
 0x7fd   : > { %v1978_v7 = vmax.f32 %v1974_v61, 0.0 }
 0x7ff   : > { %v1979_v8 = vpack.c.bf16 %v1978_v7, %v1977_v0 }
 0x801   : > { %2502 = vmatmul.mubr.msk.bf16.vlgmr.msra.gmra.mxu0 %vm2019_vm5, %v1979_v8 }
 0x8c1   : > { %v2057_v9 = vpop.f32.mrf.mxu0 }
 0x8c2   : > { %v2058_v10 = vadd.f32 %v2311_v3, %v2057_v9 }
 0x8c3   : > { %v2503_v11 = vpop.f32.mrf.mxu0 }
 0x8c4   : > { %v2064_v12 = vadd.f32 %v2058_v10, %v1907_v50 }
 0x8c5   : > { %v2060_v13 = vpop.f32.mrf.mxu0 }
 0x8c6   : > { %v2061_v14 = vadd.f32 %v2311_v3, %v2060_v13  ;;  %v2066_v15 = vsel %vm635_vm2, %v2064_v12, 0.0 }
 0x8c7   : > { %2067 = vadd.xlane.f32.xlu1 %v2066_v15  ;;  %v2504_v16 = vpop.f32.mrf.mxu0 }
 0x8c8   : > { %v2065_v17 = vadd.f32 %v2061_v14, %v1908_v51 }
 0x8ca   : > { %v2069_v18 = vsel %vm635_vm2, %v2065_v17, 0.0 }
 0x8cb   : > { %2070 = vadd.xlane.f32.xlu1 %v2069_v18 }
 0x950   : > { %v2068_v19 = vpop.xlane.xlu1 %2067 }
 0x951   : > { %v2072_v20 = vmul.f32 0.03125, %v2068_v19 }
 0x953   : > { %v2074_v21 = vsub.f32 %v2064_v12, %v2072_v20 }
 0x954   : > { %v2071_v22 = vpop.xlane.xlu1 %2070 }
 0x955   : > { %v2073_v23 = vmul.f32 0.03125, %v2071_v22  ;;  %v2076_v24 = vmul.f32 %v2074_v21, %v2074_v21 }
 0x957   : > { %v2075_v25 = vsub.f32 %v2065_v17, %v2073_v23  ;;  %v2078_v27 = vsel %vm635_vm2, %v2076_v24, 0.0 }
 0x958   : > { %2079 = vadd.xlane.f32.xlu1 %v2078_v27 }
 0x959   : > { %v2077_v62 = vmul.f32 %v2075_v25, %v2075_v25 }
 0x95b   : > { %v2081_v28 = vsel %vm635_vm2, %v2077_v62, 0.0 }
 0x95c   : > { %2082 = vadd.xlane.f32.xlu1 %v2081_v28 }
 0x9e1   : > { %v2080_v29 = vpop.xlane.xlu1 %2079 }
 0x9e2   : > { %v2084_v26 = vmul.f32 0.03125, %v2080_v29 }
 0x9e4   : > { %v2086_v30 = vadd.f32 1e-06, %v2084_v26 }
 0x9e5   : > { %v2083_v31 = vpop.xlane.xlu1 %2082 }
 0x9e6   : > { %2646 = vrsqrt.f32 %v2086_v30  ;;  %v2085_v1 = vmul.f32 0.03125, %v2083_v31 }
 0x9e8   : > { %v2087_v5 = vadd.f32 1e-06, %v2085_v1 }
 0x9ea   : > { %2648 = vrsqrt.f32 %v2087_v5 }
 0x9f3   : > { %v2647_v32 = vpop.eup %2646 }
 0x9f4   : > { %v2090_v2 = vmul.f32 %v2647_v32, %v2074_v21 }
 0x9f6   : > { %v2099_v6 = vmul.f32 %v2317_v33, %v2090_v2 }
 0x9f7   : > { %v2649_v35 = vpop.eup %2648 }
 0x9f8   : > { %v2091_v4 = vmul.f32 %v2649_v35, %v2075_v25  ;;  %v2108_v36 = vadd.f32 %v2318_v34, %v2099_v6 }
 0x9fa   : > { %v2100_v37 = vmul.f32 %v2317_v33, %v2091_v4  ;;  %2110 = vst.msk [vmem:[#allocation2] sm:$0xff] %vm635_vm2, %v2108_v36 }
 0x9fc   : > { %v2109_v38 = vadd.f32 %v2318_v34, %v2100_v37 }
 0x9fe   : > { %2111 = vst.msk [vmem:[#allocation2 + $0x8] sm:$0xff] %vm635_vm2, %v2109_v38 }
 0x9ff   : > { %2663 = shalt.err (!%p2660_p12)
}
 0xa00   : > { %s2689_s13 = smov 128   ;;  %s2690_s27 = smov 8  }
 0xa01   : > { %s3088_s15 = sld [smem:[#allocation9_spill]] }
 0xa07   : > { %2506 = dma.vmem_to_hbm [thread:$0]  (%p2509_p5), %s2119_s29, 256, %s3088_s15, [#allocation3], %s2689_s13, %s2689_s13, %s2690_s27  }
 0xa08   : > { %2679 = dma.done.wait (%p2509_p5), [#allocation3], 256  }
 0xa09   : > { %2681 = vsyncadd (%p2509_p5), [#allocation3], 4294967040 }
 0xa0a PF: > { %s3089_s18 = sld [smem:[#allocation5_spill]] }
 0xa10   : > { %s24_s25 = sadd.s32 1, %s3089_s18  }
 0xa11   : > { %p21_p13 = scmp.ge.s32.totalorder %s24_s25, 4  }
 0xa13   :  { %23 = sbr.rel (!%p21_p13) target bundleno = 6 (0x6), region = 136 }
 0xa18   :  { %2134 = vsyncpa [#allocation3], 1 }
 0xa19   :  { %2136 = vsyncpa [#allocation3 + $0x1], 1 }

</bundles_post_ra>
